<compile_context>
chip_gen: v5e
topology: v5e:2x2
jax: 0.10.0
libtpu: 0.0.40
codegen_flags: <defaults>
</compile_context>

<pallas_src>
import functools

import jax
import jax.numpy as jnp
from jax.experimental import pallas as pl
from jax.experimental.pallas import tpu as pltpu


def _keep_threshold(drop_p: float) -> int:
    """uint32 threshold t such that P(bits >= t) == 1 - drop_p."""
    return min(int(round(drop_p * (2.0 ** 32))), (1 << 32) - 1)


def _summary_eval_kernel(x_ref, w_ref, b_ref, o_ref):
    logits = jnp.dot(x_ref[...], w_ref[...], preferred_element_type=jnp.float32)
    o_ref[...] = (logits + b_ref[...]).astype(o_ref.dtype)


def _summary_train_kernel(x_ref, bits_ref, w_ref, b_ref, o_ref, *, keep_threshold):
    # Integer-threshold dropout mask: keep with probability (1 - p).
    keep = bits_ref[...] >= jnp.uint32(keep_threshold)
    x = jnp.where(keep, x_ref[...], jnp.zeros_like(x_ref[...]))
    # 1/(1-p) inverted-dropout scale is already folded into w_ref.
    logits = jnp.dot(x, w_ref[...], preferred_element_type=jnp.float32)
    o_ref[...] = (logits + b_ref[...]).astype(o_ref.dtype)


def _pick_block_b(B: int, E: int, itemsize: int) -> int:
    """Batch tile: multiple of 8, capped so one x tile is ~<= 2 MiB."""
    if B <= 8:
        return B
    max_rows = max(8, ((2 * 1024 * 1024) // max(E * itemsize, 1)) // 8 * 8)
    tb = min(B, 512, max_rows)
    return max(8, (tb // 8) * 8)


def summary_forward(output, weight, bias, *, training=False, drop_p=0.1,
                    rng_key=None, block_b=None):
    """Forward pass of Summary: logits = dropout(output) @ weight + bias.

    output: [B, E]   activations (features last, as in torch nn.Linear)
    weight: [E, 3]   transpose of torch nn.Linear.weight ([3, E])
    bias:   [3]
    """
    B, E = output.shape
    C = weight.shape[1]

    use_dropout = training and drop_p > 0.0

    # Fold the inverted-dropout scale into the (tiny) weight once.
    w_eff = weight.astype(jnp.float32)
    if use_dropout:
        w_eff = w_eff * jnp.float32(1.0 / (1.0 - drop_p))
    bias2d = bias.reshape(1, C).astype(jnp.float32)

    if block_b is None:
        block_b = _pick_block_b(B, E, output.dtype.itemsize)
    grid = (pl.cdiv(B, block_b),)

    x_spec = pl.BlockSpec((block_b, E), lambda i: (i, 0))
    w_spec = pl.BlockSpec((E, C), lambda i: (0, 0))       # VMEM-resident
    b_spec = pl.BlockSpec((1, C), lambda i: (0, 0))       # VMEM-resident
    o_spec = pl.BlockSpec((block_b, C), lambda i: (i, 0))

    # Explicit VMEM budget: double-buffered x (+ bits in training) + resident
    # weight/bias + output, with headroom. Stays well under v7x's 64 MiB.
    x_bytes = block_b * E * output.dtype.itemsize
    bits_bytes = block_b * E * 4 if use_dropout else 0
    w_bytes = E * C * 4 + C * 4
    o_bytes = block_b * C * 4
    vmem_bytes = 2 * (x_bytes + bits_bytes + o_bytes + w_bytes) + (2 << 20)
    vmem_bytes = int(min(max(vmem_bytes, 4 << 20), 48 << 20))

    compiler_params = pltpu.CompilerParams(
        dimension_semantics=("parallel",),
        vmem_limit_bytes=vmem_bytes,
    )
    out_shape = jax.ShapeDtypeStruct((B, C), output.dtype)

    if not use_dropout:
        return pl.pallas_call(
            _summary_eval_kernel,
            out_shape=out_shape,
            grid=grid,
            in_specs=[x_spec, w_spec, b_spec],
            out_specs=o_spec,
            compiler_params=compiler_params,
        )(output, w_eff, bias2d)

    if rng_key is None:
        rng_key = jax.random.PRNGKey(0)
    bits = jax.random.bits(rng_key, (B, E), dtype=jnp.uint32)
    kernel = functools.partial(_summary_train_kernel,
                               keep_threshold=_keep_threshold(drop_p))
    return pl.pallas_call(
        kernel,
        out_shape=out_shape,
        grid=grid,
        in_specs=[x_spec, x_spec, w_spec, b_spec],   # bits tiled like x
        out_specs=o_spec,
        compiler_params=compiler_params,
    )(output, bits, w_eff, bias2d)


if __name__ == "__main__":
    # Small deterministic shapes: batch=64, emb_dim=128, classes=3;
    # block_b=32 so the grid has 2 steps and pipelining is exercised.
    B, E, C = 64, 128, 3
    BLOCK_B = 32
    drop_p = 0.1

    key = jax.random.PRNGKey(0)
    kx, kw, kb, kd = jax.random.split(key, 4)

    x = jax.random.normal(kx, (B, E), dtype=jnp.float32)
    w_t = jax.random.normal(kw, (E, C), dtype=jnp.float32) / jnp.sqrt(E)
    b = jax.random.normal(kb, (C,), dtype=jnp.float32) * 0.01

    # Eval mode (dropout == identity), matching module.eval() in torch.
    logits = summary_forward(x, w_t, b, training=False, block_b=BLOCK_B)
    jax.block_until_ready(logits)
    ref = x @ w_t + b[None, :]
    assert logits.shape == (B, C)
    assert jnp.allclose(logits, ref, atol=1e-4, rtol=1e-4)

    # Training mode: verify against a reference built from the same bits.
    logits_train = summary_forward(x, w_t, b, training=True, drop_p=drop_p,
                                   rng_key=kd, block_b=BLOCK_B)
    jax.block_until_ready(logits_train)
    thr = jnp.uint32(_keep_threshold(drop_p))
    bits_ref = jax.random.bits(kd, (B, E), dtype=jnp.uint32)
    x_drop = jnp.where(bits_ref >= thr, x, 0.0)
    ref_train = x_drop @ (w_t * (1.0 / (1.0 - drop_p))) + b[None, :]
    assert logits_train.shape == (B, C)
    assert jnp.allclose(logits_train, ref_train, atol=1e-4, rtol=1e-4)

    print("KERNEL_OK")
</pallas_src>

<mosaic_0001>
module attributes {stable_mosaic.version = 11 : i64} {
  func.func @_summary_eval_kernel(%arg0: i32, %arg1: memref<32x128xf32, #tpu.memory_space<vmem>>, %arg2: memref<128x3xf32, #tpu.memory_space<vmem>>, %arg3: memref<1x3xf32, #tpu.memory_space<vmem>>, %arg4: memref<32x3xf32, #tpu.memory_space<vmem>>) attributes {dimension_semantics = [#tpu.dimension_semantics<parallel>], iteration_bounds = array<i64: 2>, scalar_prefetch = 0 : i64, scratch_operands = 0 : i64, tpu.core_type = #tpu.core_type<tc>, window_params = [{transform_indices = @transform_0, window_bounds = array<i64: 32, 128>}, {pipeline_mode = #tpu.pipeline_mode<synchronous>, transform_indices = @transform_1, window_bounds = array<i64: 128, 3>}, {pipeline_mode = #tpu.pipeline_mode<synchronous>, transform_indices = @transform_2, window_bounds = array<i64: 1, 3>}, {transform_indices = @transform_3, window_bounds = array<i64: 32, 3>}]} {
    %c0 = arith.constant 0 : index
    %c0_0 = arith.constant 0 : index
    %0 = vector.load %arg1[%c0, %c0_0] : memref<32x128xf32, #tpu.memory_space<vmem>>, vector<32x128xf32>
    %c0_1 = arith.constant 0 : index
    %c0_2 = arith.constant 0 : index
    %1 = vector.load %arg2[%c0_1, %c0_2] : memref<128x3xf32, #tpu.memory_space<vmem>>, vector<128x3xf32>
    %cst = arith.constant dense<0.000000e+00> : vector<32x3xf32>
    %2 = tpu.matmul %0, %1, %cst {dimension_numbers = #tpu.dot_dimension_numbers<[1], [0], [0], [1], [0, 0, 1, 1], [], []>} : vector<32x128xf32>, vector<128x3xf32>, vector<32x3xf32> -> vector<32x3xf32>
    %c0_3 = arith.constant 0 : index
    %c0_4 = arith.constant 0 : index
    %3 = vector.load %arg3[%c0_3, %c0_4] : memref<1x3xf32, #tpu.memory_space<vmem>>, vector<1x3xf32>
    %4 = vector.broadcast %3 : vector<1x3xf32> to vector<32x3xf32>
    %5 = arith.addf %2, %4 : vector<32x3xf32>
    %c0_5 = arith.constant 0 : index
    %c0_6 = arith.constant 0 : index
    %6 = vector.load %arg4[%c0_5, %c0_6] : memref<32x3xf32, #tpu.memory_space<vmem>>, vector<32x3xf32>
    tpu.vector_store %arg4[%c0_5, %c0_6], %5 {strides = array<i32>} : memref<32x3xf32, #tpu.memory_space<vmem>>, vector<32x3xf32>,
    return
  }
  func.func @transform_0(%arg0: i32) -> (i32, i32) {
    %c0_i32 = arith.constant 0 : i32
    %c0_i32_0 = arith.constant 0 : i32
    return %arg0, %c0_i32 : i32, i32
  }
  func.func @transform_1(%arg0: i32) -> (i32, i32) {
    %c0_i32 = arith.constant 0 : i32
    %c0_i32_0 = arith.constant 0 : i32
    %c0_i32_1 = arith.constant 0 : i32
    return %c0_i32, %c0_i32_0 : i32, i32
  }
  func.func @transform_2(%arg0: i32) -> (i32, i32) {
    %c0_i32 = arith.constant 0 : i32
    %c0_i32_0 = arith.constant 0 : i32
    %c0_i32_1 = arith.constant 0 : i32
    return %c0_i32, %c0_i32_0 : i32, i32
  }
  func.func @transform_3(%arg0: i32) -> (i32, i32) {
    %c0_i32 = arith.constant 0 : i32
    %c0_i32_0 = arith.constant 0 : i32
    return %arg0, %c0_i32 : i32, i32
  }
}

</mosaic_0001>

<bundles_post_ra>
// kernel: tpu_custom_call.1
= control target key start
LH: loop header
LB: loop body
LE: loop exit
PB: predicated region body
PF: predicated region fallthrough
CT: control target
= control target key end

     0   :  { %s384_s12 = smov 0   ;;  %s461_s0 = inlined_call_operand.vmem [shape: f32[64,128], index: 0, kind: input, shape index: {}]   ;;  %s462_s1 = inlined_call_operand.vmem [shape: f32[128,3], index: 1, kind: input, shape index: {}]   ;;  %s463_s2 = inlined_call_operand.vmem [shape: f32[1,3], index: 2, kind: input, shape index: {}]   ;;  %s464_s3 = inlined_call_operand.vmem [shape: f32[64,3], index: 3, kind: output, shape index: {}]  }
   0x1 LB: > { %s288_s13 = sadd.s32 4294967295, %s362_s12   ;;  %p292_p0 = scmp.ge.s32.totalorder %s362_s12, 1  ;;  %s362_s12 = sphi %s384_s12, %s13_s12  }
   0x2   : > { %p138_p1 = scmp.lt.s32.totalorder %s362_s12, 3 }
   0x4   : > { %p139_p2 = pnand %p292_p0, %p138_p1 }
   0x5   : > { %s293_s30 = sshll.u32 (!%p139_p2), %s288_s13, 2 }
   0x6   : > { %142 = sbr.rel (%p139_p2) target bundleno = 179 (0xb3), region = 32  ;;  %p163_p3 = scmp.lt.s32.totalorder (!%p139_p2), %s293_s30, 7 }
   0xb   : > { %v193_v0 = vld [vmem:[%s462_s1 + $0x78] sm:$0xff]  ;;  %v192_v1 = vld [vmem:[%s462_s1 + $0x70] sm:$0xff]  ;;  %v191_v2 = vld [vmem:[%s462_s1 + $0x68] sm:$0xff]  ;;  %s466_s30 = smov (!%p163_p3, %s293_s30), 7  ;;  %vm227_vm0 = vcmask 23552  }
   0xc   : > { %300 = vmatpush.msra.mxu2 %v193_v0  ;;  %301 = vmatpush.msra.mxu3 %v193_v0  ;;  %v190_v3 = vld [vmem:[%s462_s1 + $0x60] sm:$0xff]  ;;  %v189_v4 = vld [vmem:[%s462_s1 + $0x58] sm:$0xff]  ;;  %v188_v5 = vld [vmem:[%s462_s1 + $0x50] sm:$0xff]  ;;  %s294_s15 = sshll.u32 %s466_s30, 3 }
   0xd   : > { %198 = vmatpush.msra.mxu0 %v193_v0  ;;  %299 = vmatpush.msra.mxu1 %v193_v0  ;;  %v187_v6 = vld [vmem:[%s462_s1 + $0x48] sm:$0xff]  ;;  %v186_v7 = vld [vmem:[%s462_s1 + $0x40] sm:$0xff]  ;;  %v185_v8 = vld [vmem:[%s462_s1 + $0x38] sm:$0xff]  ;;  %s166_s22 = scalar_lea.vmem %s461_s0, %s294_s15  ;;  %s172_s29 = scalar_lea.vmem %s464_s3, %s294_s15 }
   0xe   : > { %303 = vmatpush.msra.mxu2 %v192_v1  ;;  %304 = vmatpush.msra.mxu3 %v192_v1  ;;  %v184_v9 = vld [vmem:[%s462_s1 + $0x30] sm:$0xff]  ;;  %v183_v10 = vld [vmem:[%s462_s1 + $0x28] sm:$0xff]  ;;  %v182_v11 = vld [vmem:[%s462_s1 + $0x20] sm:$0xff] }
   0xf   : > { %199 = vmatpush.msra.mxu0 %v192_v1  ;;  %302 = vmatpush.msra.mxu1 %v192_v1  ;;  %v181_v12 = vld [vmem:[%s462_s1 + $0x18] sm:$0xff]  ;;  %v180_v13 = vld [vmem:[%s462_s1 + $0x10] sm:$0xff]  ;;  %v179_v14 = vld [vmem:[%s462_s1 + $0x8] sm:$0xff] }
  0x10   : > { %306 = vmatpush.msra.mxu2 %v191_v2  ;;  %307 = vmatpush.msra.mxu3 %v191_v2  ;;  %v178_v15 = vld [vmem:[%s462_s1] sm:$0xff]  ;;  %v176_v16 = vld [vmem:[%s166_s22 + $0x10] sm:$0xff]  ;;  %v177_v17 = vld [vmem:[%s166_s22 + $0x18] sm:$0xff] }
  0x11   : > { %200 = vmatpush.msra.mxu0 %v191_v2  ;;  %305 = vmatpush.msra.mxu1 %v191_v2  ;;  %v174_v18 = vld [vmem:[%s166_s22] sm:$0xff]  ;;  %v175_v19 = vld [vmem:[%s166_s22 + $0x8] sm:$0xff] }
  0x12   : > { %309 = vmatpush.msra.mxu2 %v190_v3  ;;  %310 = vmatpush.msra.mxu3 %v190_v3  ;;  %v355_v20 = vld [vmem:[%s463_s2] ss:$0 sm:$0xff] }
  0x13   : > { %201 = vmatpush.msra.mxu0 %v190_v3  ;;  %308 = vmatpush.msra.mxu1 %v190_v3 }
  0x14   : > { %312 = vmatpush.msra.mxu2 %v189_v4  ;;  %313 = vmatpush.msra.mxu3 %v189_v4 }
  0x15   : > { %202 = vmatpush.msra.mxu0 %v189_v4  ;;  %311 = vmatpush.msra.mxu1 %v189_v4 }
  0x16   : > { %315 = vmatpush.msra.mxu2 %v188_v5  ;;  %316 = vmatpush.msra.mxu3 %v188_v5 }
  0x17   : > { %203 = vmatpush.msra.mxu0 %v188_v5  ;;  %314 = vmatpush.msra.mxu1 %v188_v5 }
  0x18   : > { %318 = vmatpush.msra.mxu2 %v187_v6  ;;  %319 = vmatpush.msra.mxu3 %v187_v6 }
  0x19   : > { %204 = vmatpush.msra.mxu0 %v187_v6  ;;  %317 = vmatpush.msra.mxu1 %v187_v6 }
  0x1a   : > { %321 = vmatpush.msra.mxu2 %v186_v7  ;;  %322 = vmatpush.msra.mxu3 %v186_v7 }
  0x1b   : > { %205 = vmatpush.msra.mxu0 %v186_v7  ;;  %320 = vmatpush.msra.mxu1 %v186_v7 }
  0x1c   : > { %324 = vmatpush.msra.mxu2 %v185_v8  ;;  %325 = vmatpush.msra.mxu3 %v185_v8 }
  0x1d   : > { %206 = vmatpush.msra.mxu0 %v185_v8  ;;  %323 = vmatpush.msra.mxu1 %v185_v8 }
  0x1e   : > { %327 = vmatpush.msra.mxu2 %v184_v9  ;;  %328 = vmatpush.msra.mxu3 %v184_v9 }
  0x1f   : > { %207 = vmatpush.msra.mxu0 %v184_v9  ;;  %326 = vmatpush.msra.mxu1 %v184_v9 }
  0x20   : > { %330 = vmatpush.msra.mxu2 %v183_v10  ;;  %331 = vmatpush.msra.mxu3 %v183_v10 }
  0x21   : > { %208 = vmatpush.msra.mxu0 %v183_v10  ;;  %329 = vmatpush.msra.mxu1 %v183_v10 }
  0x22   : > { %333 = vmatpush.msra.mxu2 %v182_v11  ;;  %334 = vmatpush.msra.mxu3 %v182_v11 }
  0x23   : > { %209 = vmatpush.msra.mxu0 %v182_v11  ;;  %332 = vmatpush.msra.mxu1 %v182_v11 }
  0x24   : > { %336 = vmatpush.msra.mxu2 %v181_v12  ;;  %337 = vmatpush.msra.mxu3 %v181_v12 }
  0x25   : > { %210 = vmatpush.msra.mxu0 %v181_v12  ;;  %335 = vmatpush.msra.mxu1 %v181_v12 }
  0x26   : > { %339 = vmatpush.msra.mxu2 %v180_v13  ;;  %340 = vmatpush.msra.mxu3 %v180_v13 }
  0x27   : > { %211 = vmatpush.msra.mxu0 %v180_v13  ;;  %338 = vmatpush.msra.mxu1 %v180_v13 }
  0x28   : > { %342 = vmatpush.msra.mxu2 %v179_v14  ;;  %343 = vmatpush.msra.mxu3 %v179_v14 }
  0x29   : > { %212 = vmatpush.msra.mxu0 %v179_v14  ;;  %341 = vmatpush.msra.mxu1 %v179_v14 }
  0x2a   : > { %345 = vmatpush.msra.mxu2 %v178_v15  ;;  %346 = vmatpush.msra.mxu3 %v178_v15 }
  0x2b   : > { %220 = vmatmul.f32.vlgmr.msra.gmra.mxu2 %v176_v16  ;;  %223 = vmatmul.f32.vlgmr.msra.gmra.mxu3 %v177_v17 }
  0x2c   : > { %213 = vmatpush.msra.mxu0 %v178_v15  ;;  %344 = vmatpush.msra.mxu1 %v178_v15 }
  0x2d   : > { %214 = vmatmul.f32.vlgmr.msra.gmra.mxu0 %v174_v18  ;;  %217 = vmatmul.f32.vlgmr.msra.gmra.mxu1 %v175_v19 }
  0xaa   : > { %v215_v21 = vpop.f32.mrf.mxu0  ;;  %v218_v22 = vpop.f32.mrf.mxu1 }
  0xab   : > { %v216_v23 = vadd.f32 %v355_v20, %v215_v21  ;;  %v219_v24 = vadd.f32 %v355_v20, %v218_v22 }
  0xad   : > { %228 = vst.msk [vmem:[%s172_s29] sm:$0xff] %vm227_vm0, %v216_v23 }
  0xae   : > { %229 = vst.msk [vmem:[%s172_s29 + $0x8] sm:$0xff] %vm227_vm0, %v219_v24  ;;  %v221_v25 = vpop.f32.mrf.mxu2  ;;  %v224_v26 = vpop.f32.mrf.mxu3 }
  0xaf   : > { %v222_v27 = vadd.f32 %v355_v20, %v221_v25  ;;  %v225_v28 = vadd.f32 %v355_v20, %v224_v26 }
  0xb1   : > { %230 = vst.msk [vmem:[%s172_s29 + $0x10] sm:$0xff] %vm227_vm0, %v222_v27 }
  0xb2   : > { %231 = vst.msk [vmem:[%s172_s29 + $0x18] sm:$0xff] %vm227_vm0, %v225_v28 }
  0xb3 PF: > { %s13_s12 = sadd.s32 1, %s362_s12  }
  0xb4   : > { %p10_p4 = scmp.ge.s32.totalorder %s13_s12, 4  }
  0xb6   :  { %12 = sbr.rel (!%p10_p4) target bundleno = 1 (0x1), region = 62 }

</bundles_post_ra>
